<compile_context>
chip_gen: v5e
topology: v5e:2x2
jax: 0.10.0
libtpu: 0.0.40
codegen_flags: <defaults>
</compile_context>

<pallas_src>
import math
import functools

import jax
import jax.numpy as jnp
from jax.experimental import pallas as pl
from jax.experimental.pallas import tpu as pltpu


def rgat_cell_kernel(h_ref, drop_ref, wcat_ref, vsrc_ref, adst_ref,
                     adj_rel_ref, wg_cat_ref, ug_cat_ref, uh_ref, bg_ref,
                     hnew_ref, red_ref):
    # One grid step == one batch element (batch dim squeezed by BlockSpec).
    N, H = h_ref.shape
    R = adj_rel_ref.shape[0]

    h = h_ref[...]                                   # (N, H) f32
    hd = h * drop_ref[...]                           # feature dropout (f32)
    hd_bf = hd.astype(jnp.bfloat16)

    # ---- message phase: all relations in one lane-dense MXU matmul ---------
    # msgs[:, r*H:(r+1)*H] = hd @ W_r            (bf16 in / f32 accumulate)
    msgs = jnp.dot(hd_bf, wcat_ref[...], preferred_element_type=jnp.float32)

    # per-relation source attention scores, lane-major over src nodes: (R, N)
    # src_t[r, j] = hd[j] . (W_r @ a_src_r)
    src_t = jnp.einsum('rh,nh->rn', vsrc_ref[...], hd_bf,
                       preferred_element_type=jnp.float32)
    # destination attention score per dst node: (N, 1)
    dst_score = jnp.sum(hd * adst_ref[...], axis=-1, keepdims=True)

    adj_rel = adj_rel_ref[...].astype(jnp.float32)   # (R, N_dst, N_src), 0/1
    adj = jnp.zeros((N, N), jnp.float32)
    src_part = jnp.zeros((N, N), jnp.float32)
    for r in range(R):
        a_r = adj_rel[r]
        adj = adj + a_r
        src_part = src_part + a_r * src_t[r:r + 1, :]

    # ---- reduce: masked softmax attention over incoming edges --------------
    logits = dst_score + src_part                               # (N, N)
    logits = jnp.where(logits > 0, logits, 0.2 * logits)        # LeakyReLU(0.2)
    masked = jnp.where(adj > 0.5, logits, jnp.full_like(logits, -1e9))
    mmax = jnp.max(masked, axis=-1, keepdims=True)
    p = jnp.exp(masked - mmax)
    denom = jnp.sum(p, axis=-1, keepdims=True)
    alpha = p * pl.reciprocal(denom, approx=True) * adj          # zero non-edges

    # attention-weighted reduce as R small MXU matmuls (no (N,N,H) tensor)
    red = jnp.zeros((N, H), jnp.float32)
    for r in range(R):
        alpha_r = (alpha * adj_rel[r]).astype(jnp.bfloat16)       # (N_dst, N_src)
        msg_r = msgs[:, r * H:(r + 1) * H].astype(jnp.bfloat16)   # (N_src, H)
        red = red + jnp.dot(alpha_r, msg_r,
                            preferred_element_type=jnp.float32)
    red_ref[...] = red

    # ---- apply-node: GRU(red, h) with fused gate matmuls -------------------
    bg = bg_ref[...]                                             # (3, H)
    gw = jnp.dot(red.astype(jnp.bfloat16), wg_cat_ref[...],
                 preferred_element_type=jnp.float32)             # (N, 3H)
    gu = jnp.dot(h.astype(jnp.bfloat16), ug_cat_ref[...],
                 preferred_element_type=jnp.float32)             # (N, 2H)
    z = jax.nn.sigmoid(gw[:, 0:H] + gu[:, 0:H] + bg[0:1, :])
    rg = jax.nn.sigmoid(gw[:, H:2 * H] + gu[:, H:2 * H] + bg[1:2, :])
    cu = jnp.dot((rg * h).astype(jnp.bfloat16), uh_ref[...],
                 preferred_element_type=jnp.float32)
    cand = jnp.tanh(gw[:, 2 * H:3 * H] + cu + bg[2:3, :])
    hnew_ref[...] = (1.0 - z) * h + z * cand


def rgat_cell_stack_forward(cells_params, dropout_mask, h, adj, rel_onehot,
                            step=0):
    """Equivalent of RGATCellStack.forward(g, step): one message-passing step
    with cells[step].  Returns (h_new, red) node data, each (B, N, H)."""
    p = cells_params[step]
    B, N, H = h.shape
    R = p["wrel"].shape[0]
    bf = jnp.bfloat16

    # ---- host-side weight re-packing for lane-dense single matmuls ---------
    wcat = jnp.transpose(p["wrel"], (1, 0, 2)).reshape(H, R * H)     # (H, R*H)
    vsrc = jnp.einsum('rkh,rh->rk', p["wrel"], p["asrc"])            # (R, H)
    wg_cat = jnp.transpose(p["wg"], (1, 0, 2)).reshape(H, 3 * H)     # (H, 3H)
    ug_cat = jnp.transpose(p["ug"][:2], (1, 0, 2)).reshape(H, 2 * H) # (H, 2H)
    uh = p["ug"][2]                                                  # (H, H)

    # per-relation adjacency planes (relation one-hot folded into adj); bf16
    # halves the DMA footprint of the edge grid.
    adj_rel = (adj[None, :, :] *
               jnp.transpose(rel_onehot, (2, 0, 1))).astype(bf)      # (R, N, N)

    def full(shape):
        return pl.BlockSpec(shape, lambda b: (0,) * len(shape))

    per_batch = pl.BlockSpec((None, N, H), lambda b: (b, 0, 0))

    hnew, red = pl.pallas_call(
        rgat_cell_kernel,
        out_shape=(jax.ShapeDtypeStruct((B, N, H), jnp.float32),
                   jax.ShapeDtypeStruct((B, N, H), jnp.float32)),
        grid=(B,),
        in_specs=[
            per_batch,                 # h
            full((1, H)),              # dropout mask
            full((H, R * H)),          # fused message weights
            full((R, H)),              # fused src-score vectors (W_r @ a_r)
            full((1, H)),              # dst-score vector
            full((R, N, N)),           # per-relation adjacency planes
            full((H, 3 * H)),          # fused GRU W gates
            full((H, 2 * H)),          # fused GRU U gates (z, r)
            full((H, H)),              # GRU U_h
            full((3, H)),              # GRU biases
        ],
        out_specs=(per_batch, per_batch),
        compiler_params=pltpu.CompilerParams(
            dimension_semantics=("parallel",),
            vmem_limit_bytes=32 * 1024 * 1024),
    )(h.astype(jnp.float32),
      dropout_mask.reshape(1, H).astype(jnp.float32),
      wcat.astype(bf), vsrc.astype(bf), p["adst"].astype(jnp.float32),
      adj_rel,
      wg_cat.astype(bf), ug_cat.astype(bf), uh.astype(bf),
      p["bg"].astype(jnp.float32))
    return hnew, red


def init_cell_params(key, H, R):
    ks = jax.random.split(key, 5)
    s = 1.0 / math.sqrt(H)
    return dict(
        wrel=(jax.random.normal(ks[0], (R, H, H), jnp.float32) * s),
        asrc=(jax.random.normal(ks[1], (R, H), jnp.float32) * 0.1),
        adst=(jax.random.normal(ks[2], (1, H), jnp.float32) * 0.1),
        wg=(jax.random.normal(ks[3], (3, H, H), jnp.float32) * s),
        ug=(jax.random.normal(ks[4], (3, H, H), jnp.float32) * s),
        bg=jnp.zeros((3, H), jnp.float32),
    )


if __name__ == "__main__":
    # small deterministic setup
    B, N, H, R = 2, 8, 32, 4       # batch, graph nodes, hdim, relation types
    n_cells = 2
    key = jax.random.PRNGKey(0)
    k_h, k_c = jax.random.split(key)

    # stack of cells (forward uses cells[step])
    cells_params = [init_cell_params(jax.random.fold_in(k_c, i), H, R)
                    for i in range(n_cells)]

    # dropout_mask buffer (feat_drop=0.0 -> ones, as registered in __init__)
    dropout_mask = jnp.ones((H,), jnp.float32)

    # node states: init_node_states gives zeros for 'red'; use random h
    h = jax.random.normal(k_h, (B, N, H), jnp.float32) * 0.5

    # deterministic small graph: each node i receives edges from (i+1)%N and
    # (i+3)%N, with relation type (i + j) % R on edge j -> i
    idx = jnp.arange(N)
    adj = jnp.zeros((N, N), jnp.float32)
    adj = adj.at[idx, (idx + 1) % N].set(1.0)
    adj = adj.at[idx, (idx + 3) % N].set(1.0)
    rel_ids = (idx[:, None] + idx[None, :]) % R                   # (N, N)
    rel_onehot = jax.nn.one_hot(rel_ids, R, dtype=jnp.float32)    # (N, N, R)

    fwd = jax.jit(functools.partial(rgat_cell_stack_forward, step=0))
    h_new, red = fwd(cells_params, dropout_mask, h, adj, rel_onehot)
    jax.block_until_ready((h_new, red))

    assert h_new.shape == (B, N, H) and red.shape == (B, N, H)
    assert bool(jnp.all(jnp.isfinite(h_new))) and bool(jnp.all(jnp.isfinite(red)))
    print("KERNEL_OK")
</pallas_src>

<mosaic_0001>
module attributes {stable_mosaic.version = 11 : i64} {
  func.func @rgat_cell_kernel(%arg0: i32, %arg1: memref<1x8x32xf32, #tpu.memory_space<vmem>>, %arg2: memref<1x32xf32, #tpu.memory_space<vmem>>, %arg3: memref<32x128xbf16, #tpu.memory_space<vmem>>, %arg4: memref<4x32xbf16, #tpu.memory_space<vmem>>, %arg5: memref<1x32xf32, #tpu.memory_space<vmem>>, %arg6: memref<4x8x8xbf16, #tpu.memory_space<vmem>>, %arg7: memref<32x96xbf16, #tpu.memory_space<vmem>>, %arg8: memref<32x64xbf16, #tpu.memory_space<vmem>>, %arg9: memref<32x32xbf16, #tpu.memory_space<vmem>>, %arg10: memref<3x32xf32, #tpu.memory_space<vmem>>, %arg11: memref<1x8x32xf32, #tpu.memory_space<vmem>>, %arg12: memref<1x8x32xf32, #tpu.memory_space<vmem>>) attributes {dimension_semantics = [#tpu.dimension_semantics<parallel>], iteration_bounds = array<i64: 2>, scalar_prefetch = 0 : i64, scratch_operands = 0 : i64, tpu.core_type = #tpu.core_type<tc>, window_params = [{transform_indices = @transform_0, window_bounds = array<i64: 1, 8, 32>}, {pipeline_mode = #tpu.pipeline_mode<synchronous>, transform_indices = @transform_1, window_bounds = array<i64: 1, 32>}, {pipeline_mode = #tpu.pipeline_mode<synchronous>, transform_indices = @transform_2, window_bounds = array<i64: 32, 128>}, {pipeline_mode = #tpu.pipeline_mode<synchronous>, transform_indices = @transform_3, window_bounds = array<i64: 4, 32>}, {pipeline_mode = #tpu.pipeline_mode<synchronous>, transform_indices = @transform_4, window_bounds = array<i64: 1, 32>}, {pipeline_mode = #tpu.pipeline_mode<synchronous>, transform_indices = @transform_5, window_bounds = array<i64: 4, 8, 8>}, {pipeline_mode = #tpu.pipeline_mode<synchronous>, transform_indices = @transform_6, window_bounds = array<i64: 32, 96>}, {pipeline_mode = #tpu.pipeline_mode<synchronous>, transform_indices = @transform_7, window_bounds = array<i64: 32, 64>}, {pipeline_mode = #tpu.pipeline_mode<synchronous>, transform_indices = @transform_8, window_bounds = array<i64: 32, 32>}, {pipeline_mode = #tpu.pipeline_mode<synchronous>, transform_indices = @transform_9, window_bounds = array<i64: 3, 32>}, {transform_indices = @transform_10, window_bounds = array<i64: 1, 8, 32>}, {transform_indices = @transform_11, window_bounds = array<i64: 1, 8, 32>}]} {
    %c0 = arith.constant 0 : index
    %c0_0 = arith.constant 0 : index
    %c0_1 = arith.constant 0 : index
    %0 = vector.load %arg1[%c0, %c0_0, %c0_1] : memref<1x8x32xf32, #tpu.memory_space<vmem>>, vector<1x8x32xf32>
    %1 = vector.shape_cast %0 : vector<1x8x32xf32> to vector<8x32xf32>
    %c0_2 = arith.constant 0 : index
    %c0_3 = arith.constant 0 : index
    %2 = vector.load %arg2[%c0_2, %c0_3] : memref<1x32xf32, #tpu.memory_space<vmem>>, vector<1x32xf32>
    %3 = vector.broadcast %2 : vector<1x32xf32> to vector<8x32xf32>
    %4 = arith.mulf %1, %3 : vector<8x32xf32>
    %5 = arith.truncf %4 : vector<8x32xf32> to vector<8x32xbf16>
    %c0_4 = arith.constant 0 : index
    %c0_5 = arith.constant 0 : index
    %6 = vector.load %arg3[%c0_4, %c0_5] : memref<32x128xbf16, #tpu.memory_space<vmem>>, vector<32x128xbf16>
    %cst = arith.constant dense<0.000000e+00> : vector<8x128xf32>
    %7 = tpu.matmul %5, %6, %cst {dimension_numbers = #tpu.dot_dimension_numbers<[1], [0], [0], [1], [0, 0, 1, 1], [], []>} : vector<8x32xbf16>, vector<32x128xbf16>, vector<8x128xf32> -> vector<8x128xf32>
    %c0_6 = arith.constant 0 : index
    %c0_7 = arith.constant 0 : index
    %8 = vector.load %arg4[%c0_6, %c0_7] : memref<4x32xbf16, #tpu.memory_space<vmem>>, vector<4x32xbf16>
    "tpu.trace_start"() <{level = 10 : i32, message = "rh,nh->rn"}> : () -> ()
    %cst_8 = arith.constant dense<0.000000e+00> : vector<4x8xf32>
    %9 = tpu.matmul %8, %5, %cst_8 {dimension_numbers = #tpu.dot_dimension_numbers<[1], [1], [0], [0], [0, 0, 1, 0], [], []>} : vector<4x32xbf16>, vector<8x32xbf16>, vector<4x8xf32> -> vector<4x8xf32>
    "tpu.trace_stop"() : () -> ()
    %c0_9 = arith.constant 0 : index
    %c0_10 = arith.constant 0 : index
    %10 = vector.load %arg5[%c0_9, %c0_10] : memref<1x32xf32, #tpu.memory_space<vmem>>, vector<1x32xf32>
    %11 = vector.broadcast %10 : vector<1x32xf32> to vector<8x32xf32>
    %12 = arith.mulf %4, %11 : vector<8x32xf32>
    %cst_11 = arith.constant dense<0.000000e+00> : vector<8xf32>
    %13 = vector.multi_reduction <add>, %12, %cst_11 [1] : vector<8x32xf32> to vector<8xf32>
    %14 = vector.shape_cast %13 : vector<8xf32> to vector<8x1xf32>
    %c0_12 = arith.constant 0 : index
    %c0_13 = arith.constant 0 : index
    %c0_14 = arith.constant 0 : index
    %15 = vector.load %arg6[%c0_12, %c0_13, %c0_14] : memref<4x8x8xbf16, #tpu.memory_space<vmem>>, vector<4x8x8xbf16>
    %16 = arith.extf %15 : vector<4x8x8xbf16> to vector<4x8x8xf32>
    %cst_15 = arith.constant 0.000000e+00 : f32
    %17 = vector.broadcast %cst_15 : f32 to vector<8x8xf32>
    %cst_16 = arith.constant 0.000000e+00 : f32
    %18 = vector.broadcast %cst_16 : f32 to vector<8x8xf32>
    %19 = vector.extract_strided_slice %16 {offsets = [0, 0, 0], sizes = [1, 8, 8], strides = [1, 1, 1]} : vector<4x8x8xf32> to vector<1x8x8xf32>
    %20 = vector.shape_cast %19 : vector<1x8x8xf32> to vector<8x8xf32>
    %21 = arith.addf %17, %20 : vector<8x8xf32>
    %22 = vector.extract_strided_slice %9 {offsets = [0, 0], sizes = [1, 8], strides = [1, 1]} : vector<4x8xf32> to vector<1x8xf32>
    %23 = vector.broadcast %22 : vector<1x8xf32> to vector<8x8xf32>
    %24 = arith.mulf %20, %23 : vector<8x8xf32>
    %25 = arith.addf %18, %24 : vector<8x8xf32>
    %26 = vector.extract_strided_slice %16 {offsets = [1, 0, 0], sizes = [1, 8, 8], strides = [1, 1, 1]} : vector<4x8x8xf32> to vector<1x8x8xf32>
    %27 = vector.shape_cast %26 : vector<1x8x8xf32> to vector<8x8xf32>
    %28 = arith.addf %21, %27 : vector<8x8xf32>
    %29 = vector.extract_strided_slice %9 {offsets = [1, 0], sizes = [1, 8], strides = [1, 1]} : vector<4x8xf32> to vector<1x8xf32>
    %30 = vector.broadcast %29 : vector<1x8xf32> to vector<8x8xf32>
    %31 = arith.mulf %27, %30 : vector<8x8xf32>
    %32 = arith.addf %25, %31 : vector<8x8xf32>
    %33 = vector.extract_strided_slice %16 {offsets = [2, 0, 0], sizes = [1, 8, 8], strides = [1, 1, 1]} : vector<4x8x8xf32> to vector<1x8x8xf32>
    %34 = vector.shape_cast %33 : vector<1x8x8xf32> to vector<8x8xf32>
    %35 = arith.addf %28, %34 : vector<8x8xf32>
    %36 = vector.extract_strided_slice %9 {offsets = [2, 0], sizes = [1, 8], strides = [1, 1]} : vector<4x8xf32> to vector<1x8xf32>
    %37 = vector.broadcast %36 : vector<1x8xf32> to vector<8x8xf32>
    %38 = arith.mulf %34, %37 : vector<8x8xf32>
    %39 = arith.addf %32, %38 : vector<8x8xf32>
    %40 = vector.extract_strided_slice %16 {offsets = [3, 0, 0], sizes = [1, 8, 8], strides = [1, 1, 1]} : vector<4x8x8xf32> to vector<1x8x8xf32>
    %41 = vector.shape_cast %40 : vector<1x8x8xf32> to vector<8x8xf32>
    %42 = arith.addf %35, %41 : vector<8x8xf32>
    %43 = vector.extract_strided_slice %9 {offsets = [3, 0], sizes = [1, 8], strides = [1, 1]} : vector<4x8xf32> to vector<1x8xf32>
    %44 = vector.broadcast %43 : vector<1x8xf32> to vector<8x8xf32>
    %45 = arith.mulf %41, %44 : vector<8x8xf32>
    %46 = arith.addf %39, %45 : vector<8x8xf32>
    %47 = vector.broadcast %14 : vector<8x1xf32> to vector<8x8xf32>
    %48 = arith.addf %47, %46 : vector<8x8xf32>
    %cst_17 = arith.constant 0.000000e+00 : f32
    %49 = vector.broadcast %cst_17 : f32 to vector<8x8xf32>
    %50 = arith.cmpf ogt, %48, %49 : vector<8x8xf32>
    %cst_18 = arith.constant 2.000000e-01 : f32
    %51 = vector.broadcast %cst_18 : f32 to vector<8x8xf32>
    %52 = arith.mulf %51, %48 : vector<8x8xf32>
    %53 = arith.select %50, %48, %52 : vector<8x8xi1>, vector<8x8xf32>
    %cst_19 = arith.constant 5.000000e-01 : f32
    %54 = vector.broadcast %cst_19 : f32 to vector<8x8xf32>
    %55 = arith.cmpf ogt, %42, %54 : vector<8x8xf32>
    %cst_20 = arith.constant -1.000000e+09 : f32
    %56 = vector.broadcast %cst_20 : f32 to vector<8x8xf32>
    %57 = arith.select %55, %53, %56 : vector<8x8xi1>, vector<8x8xf32>
    %cst_21 = arith.constant dense<0xFF800000> : vector<8xf32>
    %58 = vector.multi_reduction <maximumf>, %57, %cst_21 [1] : vector<8x8xf32> to vector<8xf32>
    %59 = vector.shape_cast %58 : vector<8xf32> to vector<8x1xf32>
    %60 = vector.broadcast %59 : vector<8x1xf32> to vector<8x8xf32>
    %61 = arith.subf %57, %60 : vector<8x8xf32>
    %62 = math.exp %61 : vector<8x8xf32>
    %cst_22 = arith.constant dense<0.000000e+00> : vector<8xf32>
    %63 = vector.multi_reduction <add>, %62, %cst_22 [1] : vector<8x8xf32> to vector<8xf32>
    %64 = vector.shape_cast %63 : vector<8xf32> to vector<8x1xf32>
    %65 = tpu.reciprocal %64 {approx = true} : vector<8x1xf32> -> vector<8x1xf32>
    %66 = vector.broadcast %65 : vector<8x1xf32> to vector<8x8xf32>
    %67 = arith.mulf %62, %66 : vector<8x8xf32>
    %68 = arith.mulf %67, %42 : vector<8x8xf32>
    %cst_23 = arith.constant 0.000000e+00 : f32
    %69 = vector.broadcast %cst_23 : f32 to vector<8x32xf32>
    %70 = vector.extract_strided_slice %16 {offsets = [0, 0, 0], sizes = [1, 8, 8], strides = [1, 1, 1]} : vector<4x8x8xf32> to vector<1x8x8xf32>
    %71 = vector.shape_cast %70 : vector<1x8x8xf32> to vector<8x8xf32>
    %72 = arith.mulf %68, %71 : vector<8x8xf32>
    %73 = arith.truncf %72 : vector<8x8xf32> to vector<8x8xbf16>
    %74 = vector.extract_strided_slice %7 {offsets = [0, 0], sizes = [8, 32], strides = [1, 1]} : vector<8x128xf32> to vector<8x32xf32>
    %75 = arith.truncf %74 : vector<8x32xf32> to vector<8x32xbf16>
    %cst_24 = arith.constant dense<0.000000e+00> : vector<8x32xf32>
    %76 = tpu.matmul %73, %75, %cst_24 {dimension_numbers = #tpu.dot_dimension_numbers<[1], [0], [0], [1], [0, 0, 1, 1], [], []>} : vector<8x8xbf16>, vector<8x32xbf16>, vector<8x32xf32> -> vector<8x32xf32>
    %77 = arith.addf %69, %76 : vector<8x32xf32>
    %78 = vector.extract_strided_slice %16 {offsets = [1, 0, 0], sizes = [1, 8, 8], strides = [1, 1, 1]} : vector<4x8x8xf32> to vector<1x8x8xf32>
    %79 = vector.shape_cast %78 : vector<1x8x8xf32> to vector<8x8xf32>
    %80 = arith.mulf %68, %79 : vector<8x8xf32>
    %81 = arith.truncf %80 : vector<8x8xf32> to vector<8x8xbf16>
    %82 = vector.extract_strided_slice %7 {offsets = [0, 32], sizes = [8, 32], strides = [1, 1]} : vector<8x128xf32> to vector<8x32xf32>
    %83 = arith.truncf %82 : vector<8x32xf32> to vector<8x32xbf16>
    %cst_25 = arith.constant dense<0.000000e+00> : vector<8x32xf32>
    %84 = tpu.matmul %81, %83, %cst_25 {dimension_numbers = #tpu.dot_dimension_numbers<[1], [0], [0], [1], [0, 0, 1, 1], [], []>} : vector<8x8xbf16>, vector<8x32xbf16>, vector<8x32xf32> -> vector<8x32xf32>
    %85 = arith.addf %77, %84 : vector<8x32xf32>
    %86 = vector.extract_strided_slice %16 {offsets = [2, 0, 0], sizes = [1, 8, 8], strides = [1, 1, 1]} : vector<4x8x8xf32> to vector<1x8x8xf32>
    %87 = vector.shape_cast %86 : vector<1x8x8xf32> to vector<8x8xf32>
    %88 = arith.mulf %68, %87 : vector<8x8xf32>
    %89 = arith.truncf %88 : vector<8x8xf32> to vector<8x8xbf16>
    %90 = vector.extract_strided_slice %7 {offsets = [0, 64], sizes = [8, 32], strides = [1, 1]} : vector<8x128xf32> to vector<8x32xf32>
    %91 = arith.truncf %90 : vector<8x32xf32> to vector<8x32xbf16>
    %cst_26 = arith.constant dense<0.000000e+00> : vector<8x32xf32>
    %92 = tpu.matmul %89, %91, %cst_26 {dimension_numbers = #tpu.dot_dimension_numbers<[1], [0], [0], [1], [0, 0, 1, 1], [], []>} : vector<8x8xbf16>, vector<8x32xbf16>, vector<8x32xf32> -> vector<8x32xf32>
    %93 = arith.addf %85, %92 : vector<8x32xf32>
    %94 = vector.extract_strided_slice %16 {offsets = [3, 0, 0], sizes = [1, 8, 8], strides = [1, 1, 1]} : vector<4x8x8xf32> to vector<1x8x8xf32>
    %95 = vector.shape_cast %94 : vector<1x8x8xf32> to vector<8x8xf32>
    %96 = arith.mulf %68, %95 : vector<8x8xf32>
    %97 = arith.truncf %96 : vector<8x8xf32> to vector<8x8xbf16>
    %98 = vector.extract_strided_slice %7 {offsets = [0, 96], sizes = [8, 32], strides = [1, 1]} : vector<8x128xf32> to vector<8x32xf32>
    %99 = arith.truncf %98 : vector<8x32xf32> to vector<8x32xbf16>
    %cst_27 = arith.constant dense<0.000000e+00> : vector<8x32xf32>
    %100 = tpu.matmul %97, %99, %cst_27 {dimension_numbers = #tpu.dot_dimension_numbers<[1], [0], [0], [1], [0, 0, 1, 1], [], []>} : vector<8x8xbf16>, vector<8x32xbf16>, vector<8x32xf32> -> vector<8x32xf32>
    %101 = arith.addf %93, %100 : vector<8x32xf32>
    %c0_28 = arith.constant 0 : index
    %c0_29 = arith.constant 0 : index
    %c0_30 = arith.constant 0 : index
    %102 = vector.load %arg12[%c0_28, %c0_29, %c0_30] : memref<1x8x32xf32, #tpu.memory_space<vmem>>, vector<1x8x32xf32>
    %103 = vector.shape_cast %102 : vector<1x8x32xf32> to vector<8x32xf32>
    %104 = vector.shape_cast %101 : vector<8x32xf32> to vector<1x8x32xf32>
    tpu.vector_store %arg12[%c0_28, %c0_29, %c0_30], %104 {strides = array<i32>} : memref<1x8x32xf32, #tpu.memory_space<vmem>>, vector<1x8x32xf32>,
    %c0_31 = arith.constant 0 : index
    %c0_32 = arith.constant 0 : index
    %105 = vector.load %arg10[%c0_31, %c0_32] : memref<3x32xf32, #tpu.memory_space<vmem>>, vector<3x32xf32>
    %106 = arith.truncf %101 : vector<8x32xf32> to vector<8x32xbf16>
    %c0_33 = arith.constant 0 : index
    %c0_34 = arith.constant 0 : index
    %107 = vector.load %arg7[%c0_33, %c0_34] : memref<32x96xbf16, #tpu.memory_space<vmem>>, vector<32x96xbf16>
    %cst_35 = arith.constant dense<0.000000e+00> : vector<8x96xf32>
    %108 = tpu.matmul %106, %107, %cst_35 {dimension_numbers = #tpu.dot_dimension_numbers<[1], [0], [0], [1], [0, 0, 1, 1], [], []>} : vector<8x32xbf16>, vector<32x96xbf16>, vector<8x96xf32> -> vector<8x96xf32>
    %109 = arith.truncf %1 : vector<8x32xf32> to vector<8x32xbf16>
    %c0_36 = arith.constant 0 : index
    %c0_37 = arith.constant 0 : index
    %110 = vector.load %arg8[%c0_36, %c0_37] : memref<32x64xbf16, #tpu.memory_space<vmem>>, vector<32x64xbf16>
    %cst_38 = arith.constant dense<0.000000e+00> : vector<8x64xf32>
    %111 = tpu.matmul %109, %110, %cst_38 {dimension_numbers = #tpu.dot_dimension_numbers<[1], [0], [0], [1], [0, 0, 1, 1], [], []>} : vector<8x32xbf16>, vector<32x64xbf16>, vector<8x64xf32> -> vector<8x64xf32>
    %112 = vector.extract_strided_slice %108 {offsets = [0, 0], sizes = [8, 32], strides = [1, 1]} : vector<8x96xf32> to vector<8x32xf32>
    %113 = vector.extract_strided_slice %111 {offsets = [0, 0], sizes = [8, 32], strides = [1, 1]} : vector<8x64xf32> to vector<8x32xf32>
    %114 = arith.addf %112, %113 : vector<8x32xf32>
    %115 = vector.extract_strided_slice %105 {offsets = [0, 0], sizes = [1, 32], strides = [1, 1]} : vector<3x32xf32> to vector<1x32xf32>
    %116 = vector.broadcast %115 : vector<1x32xf32> to vector<8x32xf32>
    %117 = arith.addf %114, %116 : vector<8x32xf32>
    %118 = arith.negf %117 : vector<8x32xf32>
    %119 = math.exp %118 : vector<8x32xf32>
    %cst_39 = arith.constant 1.000000e+00 : f32
    %120 = vector.broadcast %cst_39 : f32 to vector<8x32xf32>
    %121 = arith.addf %120, %119 : vector<8x32xf32>
    %122 = arith.divf %120, %121 : vector<8x32xf32>
    %123 = vector.extract_strided_slice %108 {offsets = [0, 32], sizes = [8, 32], strides = [1, 1]} : vector<8x96xf32> to vector<8x32xf32>
    %124 = vector.extract_strided_slice %111 {offsets = [0, 32], sizes = [8, 32], strides = [1, 1]} : vector<8x64xf32> to vector<8x32xf32>
    %125 = arith.addf %123, %124 : vector<8x32xf32>
    %126 = vector.extract_strided_slice %105 {offsets = [1, 0], sizes = [1, 32], strides = [1, 1]} : vector<3x32xf32> to vector<1x32xf32>
    %127 = vector.broadcast %126 : vector<1x32xf32> to vector<8x32xf32>
    %128 = arith.addf %125, %127 : vector<8x32xf32>
    %129 = arith.negf %128 : vector<8x32xf32>
    %130 = math.exp %129 : vector<8x32xf32>
    %cst_40 = arith.constant 1.000000e+00 : f32
    %131 = vector.broadcast %cst_40 : f32 to vector<8x32xf32>
    %132 = arith.addf %131, %130 : vector<8x32xf32>
    %133 = arith.divf %131, %132 : vector<8x32xf32>
    %134 = arith.mulf %133, %1 : vector<8x32xf32>
    %135 = arith.truncf %134 : vector<8x32xf32> to vector<8x32xbf16>
    %c0_41 = arith.constant 0 : index
    %c0_42 = arith.constant 0 : index
    %136 = vector.load %arg9[%c0_41, %c0_42] : memref<32x32xbf16, #tpu.memory_space<vmem>>, vector<32x32xbf16>
    %cst_43 = arith.constant dense<0.000000e+00> : vector<8x32xf32>
    %137 = tpu.matmul %135, %136, %cst_43 {dimension_numbers = #tpu.dot_dimension_numbers<[1], [0], [0], [1], [0, 0, 1, 1], [], []>} : vector<8x32xbf16>, vector<32x32xbf16>, vector<8x32xf32> -> vector<8x32xf32>
    %138 = vector.extract_strided_slice %108 {offsets = [0, 64], sizes = [8, 32], strides = [1, 1]} : vector<8x96xf32> to vector<8x32xf32>
    %139 = arith.addf %138, %137 : vector<8x32xf32>
    %140 = vector.extract_strided_slice %105 {offsets = [2, 0], sizes = [1, 32], strides = [1, 1]} : vector<3x32xf32> to vector<1x32xf32>
    %141 = vector.broadcast %140 : vector<1x32xf32> to vector<8x32xf32>
    %142 = arith.addf %139, %141 : vector<8x32xf32>
    %143 = math.tanh %142 : vector<8x32xf32>
    %cst_44 = arith.constant 1.000000e+00 : f32
    %144 = vector.broadcast %cst_44 : f32 to vector<8x32xf32>
    %145 = arith.subf %144, %122 : vector<8x32xf32>
    %146 = arith.mulf %145, %1 : vector<8x32xf32>
    %147 = arith.mulf %122, %143 : vector<8x32xf32>
    %148 = arith.addf %146, %147 : vector<8x32xf32>
    %c0_45 = arith.constant 0 : index
    %c0_46 = arith.constant 0 : index
    %c0_47 = arith.constant 0 : index
    %149 = vector.load %arg11[%c0_45, %c0_46, %c0_47] : memref<1x8x32xf32, #tpu.memory_space<vmem>>, vector<1x8x32xf32>
    %150 = vector.shape_cast %149 : vector<1x8x32xf32> to vector<8x32xf32>
    %151 = vector.shape_cast %148 : vector<8x32xf32> to vector<1x8x32xf32>
    tpu.vector_store %arg11[%c0_45, %c0_46, %c0_47], %151 {strides = array<i32>} : memref<1x8x32xf32, #tpu.memory_space<vmem>>, vector<1x8x32xf32>,
    return
  }
  func.func @transform_0(%arg0: i32) -> (i32, i32, i32) {
    %c0_i32 = arith.constant 0 : i32
    %c0_i32_0 = arith.constant 0 : i32
    %c0_i32_1 = arith.constant 0 : i32
    return %arg0, %c0_i32, %c0_i32_0 : i32, i32, i32
  }
  func.func @transform_1(%arg0: i32) -> (i32, i32) {
    %c0_i32 = arith.constant 0 : i32
    %c0_i32_0 = arith.constant 0 : i32
    %c0_i32_1 = arith.constant 0 : i32
    return %c0_i32, %c0_i32_0 : i32, i32
  }
  func.func @transform_2(%arg0: i32) -> (i32, i32) {
    %c0_i32 = arith.constant 0 : i32
    %c0_i32_0 = arith.constant 0 : i32
    %c0_i32_1 = arith.constant 0 : i32
    return %c0_i32, %c0_i32_0 : i32, i32
  }
  func.func @transform_3(%arg0: i32) -> (i32, i32) {
    %c0_i32 = arith.constant 0 : i32
    %c0_i32_0 = arith.constant 0 : i32
    %c0_i32_1 = arith.constant 0 : i32
    return %c0_i32, %c0_i32_0 : i32, i32
  }
  func.func @transform_4(%arg0: i32) -> (i32, i32) {
    %c0_i32 = arith.constant 0 : i32
    %c0_i32_0 = arith.constant 0 : i32
    %c0_i32_1 = arith.constant 0 : i32
    return %c0_i32, %c0_i32_0 : i32, i32
  }
  func.func @transform_5(%arg0: i32) -> (i32, i32, i32) {
    %c0_i32 = arith.constant 0 : i32
    %c0_i32_0 = arith.constant 0 : i32
    %c0_i32_1 = arith.constant 0 : i32
    %c0_i32_2 = arith.constant 0 : i32
    return %c0_i32, %c0_i32_0, %c0_i32_1 : i32, i32, i32
  }
  func.func @transform_6(%arg0: i32) -> (i32, i32) {
    %c0_i32 = arith.constant 0 : i32
    %c0_i32_0 = arith.constant 0 : i32
    %c0_i32_1 = arith.constant 0 : i32
    return %c0_i32, %c0_i32_0 : i32, i32
  }
  func.func @transform_7(%arg0: i32) -> (i32, i32) {
    %c0_i32 = arith.constant 0 : i32
    %c0_i32_0 = arith.constant 0 : i32
    %c0_i32_1 = arith.constant 0 : i32
    return %c0_i32, %c0_i32_0 : i32, i32
  }
  func.func @transform_8(%arg0: i32) -> (i32, i32) {
    %c0_i32 = arith.constant 0 : i32
    %c0_i32_0 = arith.constant 0 : i32
    %c0_i32_1 = arith.constant 0 : i32
    return %c0_i32, %c0_i32_0 : i32, i32
  }
  func.func @transform_9(%arg0: i32) -> (i32, i32) {
    %c0_i32 = arith.constant 0 : i32
    %c0_i32_0 = arith.constant 0 : i32
    %c0_i32_1 = arith.constant 0 : i32
    return %c0_i32, %c0_i32_0 : i32, i32
  }
  func.func @transform_10(%arg0: i32) -> (i32, i32, i32) {
    %c0_i32 = arith.constant 0 : i32
    %c0_i32_0 = arith.constant 0 : i32
    %c0_i32_1 = arith.constant 0 : i32
    return %arg0, %c0_i32, %c0_i32_0 : i32, i32, i32
  }
  func.func @transform_11(%arg0: i32) -> (i32, i32, i32) {
    %c0_i32 = arith.constant 0 : i32
    %c0_i32_0 = arith.constant 0 : i32
    %c0_i32_1 = arith.constant 0 : i32
    return %arg0, %c0_i32, %c0_i32_0 : i32, i32, i32
  }
}

</mosaic_0001>

<bundles_post_ra>
// kernel: rgat_cell_stack_forward.1
= control target key start
LH: loop header
LB: loop body
LE: loop exit
PB: predicated region body
PF: predicated region fallthrough
CT: control target
= control target key end

     0   :  { %s1402_s0 = inlined_call_operand.vmem [shape: f32[2,8,32], index: 0, kind: input, shape index: {}]   ;;  %s1403_s1 = inlined_call_operand.vmem [shape: f32[1,32], index: 1, kind: input, shape index: {}]   ;;  %s1404_s2 = inlined_call_operand.vmem [shape: bf16[32,128], index: 2, kind: input, shape index: {}]   ;;  %s1405_s3 = inlined_call_operand.vmem [shape: bf16[4,32], index: 3, kind: input, shape index: {}]   ;;  %s1406_s4 = inlined_call_operand.vmem [shape: f32[1,32], index: 4, kind: input, shape index: {}]   ;;  %s1407_s5 = inlined_call_operand.vmem [shape: bf16[4,8,8], index: 5, kind: input, shape index: {}]   ;;  %s1408_s6 = inlined_call_operand.vmem [shape: bf16[32,96], index: 6, kind: input, shape index: {}]   ;;  %s1409_s7 = inlined_call_operand.vmem [shape: bf16[32,64], index: 7, kind: input, shape index: {}]   ;;  %s1410_s8 = inlined_call_operand.vmem [shape: bf16[32,32], index: 8, kind: input, shape index: {}]   ;;  %s1411_s9 = inlined_call_operand.vmem [shape: f32[3,32], index: 9, kind: input, shape index: {}]   ;;  %s1412_s10 = inlined_call_operand.hbm [shape: f32[2,8,32], index: 10, kind: output, shape index: {0}]   ;;  %s1413_s11 = inlined_call_operand.hbm [shape: f32[2,8,32], index: 11, kind: output, shape index: {1}]  }
   0x1   :  { %1417 = sst [smem:[#allocation8_spill]] %s1402_s0 }
   0x2   :  { %1418 = sst [smem:[#allocation9_spill]] %s1403_s1 }
   0x3   :  { %1419 = sst [smem:[#allocation10_spill]] %s1404_s2 }
   0x4   :  { %1420 = sst [smem:[#allocation11_spill]] %s1405_s3 }
   0x5   :  { %1421 = sst [smem:[#allocation12_spill]] %s1406_s4 }
   0x6   :  { %1422 = sst [smem:[#allocation13_spill]] %s1407_s5 }
   0x7   :  { %1423 = sst [smem:[#allocation14_spill]] %s1408_s6 }
   0x8   :  { %17 = vsyncpa [#allocation3], 0 }
   0x9   :  { %19 = vsyncpa [#allocation3 + $0x1], 0 }
   0xa   :  { %20 = vsyncpa [#allocation5], 0 }
   0xb   :  { %22 = vsyncpa [#allocation5 + $0x1], 0  ;;  %s1196_s17 = smov 0   ;;  %s1198_s18 = smov 0  }
   0xc   :  { %s1200_s19 = smov 0   ;;  %s1202_s20 = smov 0  }
   0xd LB: > { %s1217_s21 = sadd.s32 4294967295, %s1131_s20   ;;  %s901_s22 = sadd.s32 4294967294, %s1131_s20   ;;  %s1131_s20 = sphi %s1202_s20, %s1438_s20   ;;  %s1127_s19 = sphi %s1200_s19, %s1437_s19   ;;  %s1123_s18 = sphi %s1198_s18, %s1436_s18   ;;  %s1119_s17 = sphi %s1196_s17, %s1435_s17  }
   0xe   : > { %s1221_s23 = sadd.s32 1, %s1131_s20   ;;  %s250_s24 = sadd.s32 1, %s1127_s19 }
   0xf   : > { %s247_s25 = ssub.s32 %s1131_s20, %s1221_s23  ;;  %p260_p0 = scmp.ne.s32.totalorder %s1127_s19, %s1123_s18 }
  0x10   : > { %p248_p1 = scmp.eq.s32.totalorder %s247_s25, 0  ;;  %p261_p2 = scmp.eq.s32.totalorder %s1217_s21, 1 }
  0x11   : > { %p266_p3 = scmp.ne.s32.totalorder %s1123_s18, %s1119_s17  ;;  %p267_p4 = scmp.eq.s32.totalorder %s901_s22, 1 }
  0x12   : > { %s1232_s26 = scalar_select %p248_p1, %s1127_s19, %s250_s24  }
  0x13   : > { %p1234_p5 = por %p261_p2, %p260_p0  ;;  %p1238_p6 = por %p267_p4, %p266_p3 }
  0x14   : > { %p904_p7 = scmp.ge.s32.totalorder %s1131_s20, 1  ;;  %p345_p8 = scmp.lt.s32.totalorder %s1131_s20, 3 }
  0x16   : > { %p346_p9 = pnand %p904_p7, %p345_p8 }
  0x17   : > { %p389_p10 = scmp.lt.s32.totalorder (!%p346_p9), %s1217_s21, 1  ;;  %s1426_s1 = sld [smem:[#allocation9_spill]] (!%p346_p9) }
  0x18   : > { %349 = sbr.rel (%p346_p9) target bundleno = 1224 (0x4c8), region = 60  ;;  %s1427_s0 = sld [smem:[#allocation8_spill]] (!%p346_p9) }
  0x19   : > { %s1428_s4 = sld [smem:[#allocation12_spill]] (!%p346_p9)  ;;  %s1414_s25 = smov (!%p346_p9), 64  }
  0x1a   : > { %s1429_s3 = sld [smem:[#allocation11_spill]] (!%p346_p9)  ;;  %s1135_s30 = smov (!%p346_p9), 96  }
  0x1b   : > { %s1430_s2 = sld [smem:[#allocation10_spill]] (!%p346_p9)  ;;  %s1433_s12 = smov (!%p346_p9), 64  }
  0x1c   : > { %s1431_s5 = sld [smem:[#allocation13_spill]] (!%p346_p9) }
  0x1d   : > { %s390_s29 = scalar_select %p389_p10, %s1217_s21, 1  ;;  %v1021_v0 = vld [vmem:[%s1426_s1] ss:$0 sm:$0xff]  ;;  %vm417_vm0 = vcmask 261120   ;;  %vm489_vm3 = vcmask 64512   ;;  %vm513_vm4 = vcmask 1043456  }
  0x1e   : > { %s1432_s6 = sld [smem:[#allocation14_spill]] }
  0x1f   : > { %s907_s13 = sshll.u32 %s390_s29, 3  ;;  %v1022_v1 = vld [vmem:[%s1428_s4] ss:$0 sm:$0xff]  ;;  %s1134_s29 = smov 32  }
  0x20   : > { %s392_s16 = scalar_lea.vmem %s1427_s0, %s907_s13  ;;  %v434_v8 = vld [vmem:[%s1429_s3] sm:$0x3]  ;;  %s953_s13 = sshll.u32 %s1217_s21, 3 }
  0x21   : > { %v1255_v2 = vld [vmem:[%s392_s16] sm:$0xff]  ;;  %v958_v9 = vld [vmem:[%s1430_s2 + $0x8] sm:$0xff]  ;;  %s804_s16 = scalar_lea.hbm %s1413_s11, %s953_s13  ;;  %s1057_s4 = scalar_lea.hbm %s1413_s11, 16 }
  0x22   : > { %v399_v3 = vmul.f32 %v1021_v0, %v1255_v2  ;;  %427 = vmatpush.bf16.msra.mxu0 %v958_v9  ;;  %v957_v10 = vld [vmem:[%s1430_s2] sm:$0xff]  ;;  %v973_v12 = vld [vmem:[%s1431_s5 + $0x8] sm:$0xff]   ;;  %s808_s24 = sshll.u32 %s804_s16, 4  ;;  %s809_s24 = int_to_ptr.hbm [resolvable:$true] %s808_s24 }
  0x23   : > { %v966_v11 = vld [vmem:[%s1431_s5] sm:$0xff]   ;;  %v1277_v16 = vunpack.c.l.bf16 %v973_v12  ;;  %v972_v24 = vunpack.c.h.bf16 %v973_v12  ;;  %s1051_s0 = sshra.s32 %s809_s24, 4  ;;  %s1052_s0 = int_to_ptr.hbm [resolvable:$true] %s1051_s0 }
  0x24   : > { %v400_v4 = vpack.c.bf16 %v399_v3, %v399_v3  ;;  %v455_v5 = vmul.f32 %v1022_v1, %v399_v3  ;;  %v967_v13 = vunpack.c.l.bf16 %v966_v11  ;;  %v968_v14 = vunpack.c.h.bf16 %v966_v11  ;;  %v960_v3 = vld [vmem:[%s1432_s6 + $0x8] sm:$0xff]  ;;  %v1315_v9 = vld [vmem:[%s1411_s9] sm:$0x7]  ;;  %s1053_s1 = scalar_lea.hbm %s1052_s0, 8  ;;  %p1058_p0 = scmp.lt.s32.totalorder %s1052_s0, %s1413_s11 }
  0x25   : > { %p1054_p11 = scmp.ne.s32.totalorder %s1052_s0, %s1053_s1  ;;  %p1059_p1 = scmp.lt.s32.totalorder %s1057_s4, %s1053_s1 }
  0x26   : > { %v419_v6 = vsel %vm417_vm0, %v400_v4, 0  ;;  %v456_v7 = vsel %vm417_vm0, %v455_v5, 0.0  ;;  %428 = vmatpush.bf16.msra.mxu0 %v957_v10  ;;  %v471_v20 = vadd.f32 %v968_v14, %v967_v13  ;;  %v961_v5 = vld [vmem:[%s1409_s7] sm:$0xff]  ;;  %v687_v10 = vperm.slane %v1315_v9, 1 }
  0x27   : > { %445 = vmatpush.bf16.xpose.msra.mxu1 %v419_v6  ;;  %457 = vadd.xlane.f32.xlu0 %v456_v7  ;;  %v959_v6 = vld [vmem:[%s1432_s6] sm:$0xff]  ;;  %v632_v7 = vpack.c.bf16 %v1255_v2, %v1255_v2  ;;  %p1055_p12 = pnand %p1054_p11, %p1234_p5  ;;  %p1060_p2 = por %p1059_p1, %p1058_p0 }
  0x28   : > { %v475_v27 = vadd.f32 %v1277_v16, %v471_v20 }
  0x29   : > { %916 = vmatmul.msk.bf16.vlgmr.msra.gmra.mxu0 %vm417_vm0, %v400_v4  ;;  %v962_v4 = vld [vmem:[%s1409_s7 + $0x8] sm:$0xff]  ;;  %p1056_p13 = pneg %p1055_p12 }
  0x2a   : > { %v479_v33 = vadd.f32 %v972_v24, %v475_v27  ;;  %625 = vmatpush.bf16.msrb.mxu0 %v960_v3 }
  0x2b   : > { %p1061_p3 = pnand %p1060_p2, %p1056_p13 }
  0x2c   : > { %vm487_vm2 = vcmp.gt.f32.partialorder %v479_v33, 0.5 }
  0x2e   : > { %917 = vmatmul.msk.bf16.vlgmr.msra.gmra.mxu1 %vm417_vm0, %v434_v8  ;;  %626 = vmatpush.bf16.msrb.mxu0 %v959_v6 }
  0x2f   : > { %658 = vmatpush.bf16.msrb.mxu1 %v962_v4 }
  0x33   : > { %659 = vmatpush.bf16.msrb.mxu1 %v961_v5 }
  0x3e   : > { %939 = vmatmul.msk.bf16.vlgmr.msrb.gmra.mxu1 %vm417_vm0, %v632_v7 }
  0x9a   : > { %v458_v31 = vpop.xlane.xlu0 %457 }
  0xa6   : > { %v430_v39 = vpop.f32.mrf.mxu0 }
  0xa7   : > { %v504_v40 = vpack.c.bf16 %v430_v39, %v430_v39 }
  0xa9   : > { %551 = vrot.lane.b32.xlu2 %v504_v40, %s1414_s25  ;;  %v534_v45 = vsel %vm513_vm4, %v504_v40, 0  ;;  %s1320_s25 = sand.u32 1, %s1123_s18  }
  0xaa   : > { %543 = vmatpush.bf16.msra.mxu3 %v534_v45  ;;  %s1416_s14 = sshll.u32 %s1320_s25, 3 }
  0xab   : > { %v447_v15 = vpop.f32.mrf.mxu1  ;;  %s1325_s15 = scalar_lea.vmem [#allocation4], %s1416_s14  ;;  %s780_s14 = scalar_lea.sflag [#allocation5], %s1320_s25 }
  0xac   : > { %v468_v17 = vperm.slane %v447_v15, 0  ;;  %v472_v18 = vperm.slane %v447_v15, 1  ;;  %v476_v19 = vperm.slane %v447_v15, 2  ;;  %v480_v23 = vperm.slane %v447_v15, 3  ;;  %s806_s22 = sshll.u32 %s1325_s15, 4  ;;  %s807_s22 = int_to_ptr.vmem [resolvable:$true] %s806_s22 }
  0xae   : > { %v469_v21 = vmul.f32 %v967_v13, %v468_v17  ;;  %v473_v22 = vmul.f32 %v968_v14, %v472_v18  ;;  %v477_v26 = vmul.f32 %v1277_v16, %v476_v19  ;;  %v481_v29 = vmul.f32 %v972_v24, %v480_v23  ;;  %v432_v41 = vpop.f32.mrf.mxu0 }
  0xb0   : > { %v474_v25 = vadd.f32 %v473_v22, %v469_v21 }
  0xb1   : > { %575 = vrot.lane.b32.xlu2 %v504_v40, %s1134_s29 }
  0xb2   : > { %v478_v28 = vadd.f32 %v477_v26, %v474_v25 }
  0xb3   : > { %v449_v30 = vpop.f32.mrf.mxu1 }
  0xb4   : > { %v482_v32 = vadd.f32 %v481_v29, %v478_v28  ;;  %v964_v29 = vld [vmem:[%s1410_s8 + $0x8] sm:$0xff] }
  0xb6   : > { %v483_v34 = vadd.f32 %v482_v32, %v458_v31  ;;  %v963_v31 = vld [vmem:[%s1410_s8] sm:$0xff] }
  0xb8   : > { %v485_v35 = vmul.f32 0.2, %v483_v34  ;;  %vm484_vm1 = vcmp.gt.f32.partialorder %v483_v34, 0.0 }
  0xb9   : > { %713 = vrot.lane.b32.xlu2 %v1255_v2, %s1134_s29 }
  0xba   : > { %v486_v36 = vsel %vm484_vm1, %v483_v34, %v485_v35 }
  0xbb   : > { %v488_v37 = vsel %vm487_vm2, %v486_v36, -1e+09  ;;  %v661_v22 = vpop.f32.mrf.mxu1 }
  0xbc   : > { %v490_v38 = vsel %vm489_vm3, %v488_v37, -inf }
  0xbd   : > { %491 = vmax.xlane.f32.xlu0 %v490_v38 }
  0xc3   : > { %v663_v23 = vpop.f32.mrf.mxu1 }
  0xd1   : > { %689 = vrot.lane.b32.xlu0 %v687_v10, %s1134_s29 }
 0x103   : > { %v552_v48 = vpop.permute.xlu2 %551 }
 0x104   : > { %v557_v60 = vsel %vm513_vm4, %v552_v48, 0 }
 0x10b   : > { %v576_v49 = vpop.permute.xlu2 %575 }
 0x10c   : > { %v581_v50 = vsel %vm513_vm4, %v576_v49, 0 }
 0x10d   : > { %590 = vmatpush.bf16.msrb.mxu3 %v581_v50 }
 0x113   : > { %v714_v41 = vpop.permute.xlu2 %713 }
 0x130   : > { %v492_v42 = vpop.xlane.xlu0 %491 }
 0x131   : > { %v493_v43 = vsub.f32 %v488_v37, %v492_v42 }
 0x133   : > { %v494_v44 = vmul.f32 1.442695, %v493_v43 }
 0x135   : > { %1023 = vpow2.f32 %v494_v44 }
 0x13b   : > { %v1024_v46 = vpop.eup %1023 }
 0x13c   : > { %v496_v47 = vsel %vm489_vm3, %v1024_v46, 0.0 }
 0x13d   : > { %497 = vadd.xlane.f32.xlu1 %v496_v47  ;;  %v758_v47 = vperm.slane %v1315_v9, 2 }
 0x143   : > { %v690_v25 = vpop.permute.xlu0 %689 }
 0x156   : > { %508 = vrot.lane.b32.xlu1 %v504_v40, %s1135_s30 }
 0x15e   : > { %760 = vrot.lane.b32.xlu1 %v758_v47, %s1433_s12 }
 0x1b0   : > { %v498_v51 = vpop.xlane.xlu1 %497 }
 0x1b1   : > { %1025 = vrcp.f32 %v498_v51 }
 0x1b7   : > { %v1026_v52 = vpop.eup %1025 }
 0x1b8   : > { %v500_v53 = vmul.f32 %v1026_v52, %v1024_v46 }
 0x1ba   : > { %v501_v54 = vmul.f32 %v500_v53, %v479_v33 }
 0x1bc   : > { %v502_v55 = vmul.f32 %v967_v13, %v501_v54  ;;  %v505_v57 = vmul.f32 %v968_v14, %v501_v54  ;;  %v573_v61 = vmul.f32 %v972_v24, %v501_v54  ;;  %v549_v0 = vmul.f32 %v1277_v16, %v501_v54 }
 0x1be   : > { %v503_v56 = vpack.c.bf16 %v502_v55, %v502_v55  ;;  %v506_v62 = vpack.c.bf16 %v505_v57, %v505_v57  ;;  %v574_v63 = vpack.c.bf16 %v573_v61, %v573_v61  ;;  %v550_v1 = vpack.c.bf16 %v549_v0, %v549_v0 }
 0x1c0   : > { %919 = vmatmul.msk.bf16.vlgmr.msra.gmra.mxu3 %vm489_vm3, %v503_v56 }
 0x1c8   : > { %v509_v58 = vpop.permute.xlu1 %508 }
 0x1c9   : > { %v515_v59 = vsel %vm513_vm4, %v509_v58, 0 }
 0x1ca   : > { %524 = vmatpush.bf16.msra.mxu2 %v515_v59 }
 0x1cd   : > { %918 = vmatmul.msk.bf16.vlgmr.msra.gmra.mxu2 %vm489_vm3, %v506_v62 }
 0x1ce   : > { %566 = vmatpush.bf16.msrb.mxu2 %v557_v60 }
 0x1d0   : > { %921 = vmatmul.msk.bf16.vlgmr.msrb.gmra.mxu3 %vm489_vm3, %v574_v63  ;;  %v761_v52 = vpop.permute.xlu1 %760 }
 0x1d2   : > { %746 = vmatpush.bf16.msra.mxu2 %v964_v29 }
 0x1d6   : > { %747 = vmatpush.bf16.msra.mxu2 %v963_v31 }
 0x1dd   : > { %920 = vmatmul.msk.bf16.vlgmr.msrb.gmra.mxu2 %vm489_vm3, %v550_v1 }
 0x243   : > { %v545_v8 = vpop.f32.mrf.mxu3 }
 0x24b   : > { %v547_v11 = vpop.f32.mrf.mxu3 }
 0x250   : > { %v526_v12 = vpop.f32.mrf.mxu2 }
 0x251   : > { %v546_v16 = vadd.f32 %v545_v8, %v526_v12 }
 0x253   : > { %v592_v13 = vpop.f32.mrf.mxu3 }
 0x258   : > { %v528_v14 = vpop.f32.mrf.mxu2 }
 0x25b   : > { %v594_v15 = vpop.f32.mrf.mxu3 }
 0x260   : > { %v568_v17 = vpop.f32.mrf.mxu2 }
 0x261   : > { %v572_v18 = vadd.f32 %v568_v17, %v546_v16 }
 0x263   : > { %v596_v19 = vadd.f32 %v592_v13, %v572_v18 }
 0x265   : > { %v599_v20 = vpack.c.bf16 %v596_v19, %v596_v19  ;;  %597 = vst.msk [vmem:[%s1325_s15] sm:$0xff] %vm417_vm0, %v596_v19 }
 0x267   : > { %930 = vmatmul.msk.bf16.vlgmr.msrb.gmra.mxu0 %vm417_vm0, %v599_v20 }
 0x268   : > { %v570_v21 = vpop.f32.mrf.mxu2 }
 0x2e4   : > { %v628_v24 = vpop.f32.mrf.mxu0 }
 0x2e5   : > { %v1330_v26 = vadd.f32 %v661_v22, %v628_v24 }
 0x2e7   : > { %v692_v27 = vadd.f32 %v690_v25, %v1330_v26 }
 0x2e9   : > { %v941_v28 = vmul.f32 -1.442695, %v692_v27 }
 0x2eb   : > { %1027 = vpow2.f32 %v941_v28 }
 0x2ec   : > { %v630_v30 = vpop.f32.mrf.mxu0 }
 0x2f1   : > { %v1028_v32 = vpop.eup %1027 }
 0x2f2   : > { %v696_v33 = vadd.f32 1.0, %v1028_v32 }
 0x2f4   : > { %1029 = vrcp.f32 %v696_v33  ;;  %v708_v37 = vand.u32 2147483648, %v696_v33  ;;  %v706_v39 = vand.u32 2147483647, %v696_v33  ;;  %vm702_vm6 = vweird.f32 %v696_v33 }
 0x2f6   : > { %v709_v42 = vor.u32 1.1754944e-38, %v708_v37  ;;  %vm707_vm8 = vcmp.eq.f32.partialorder %v706_v39, 8.507059e+37 }
 0x2fa   : > { %v1030_v34 = vpop.eup %1029 }
 0x2fb   : > { %v698_v35 = vmul.f32 %v1030_v34, %v696_v33  ;;  %vm703_vm5 = vweird.f32 %v1030_v34 }
 0x2fc   : > { %vm704_vm7 = vmor %vm702_vm6, %vm703_vm5 }
 0x2fd   : > { %v699_v36 = vsub.f32 1.0, %v698_v35 }
 0x2ff   : > { %v700_v38 = vmul.f32 %v1030_v34, %v699_v36 }
 0x301   : > { %v701_v40 = vadd.f32 %v1030_v34, %v700_v38 }
 0x303   : > { %v705_v43 = vsel %vm704_vm7, %v1030_v34, %v701_v40 }
 0x304   : > { %v710_v44 = vsel %vm707_vm8, %v709_v42, %v705_v43 }
 0x305   : > { %v716_v45 = vmul.f32 %v714_v41, %v710_v44 }
 0x307   : > { %v717_v46 = vpack.c.bf16 %v716_v45, %v716_v45 }
 0x309   : > { %723 = vrot.lane.b32.xlu2 %v717_v46, %s1135_s30 }
 0x363   : > { %v724_v48 = vpop.permute.xlu2 %723 }
 0x364   : > { %950 = vmatmul.msk.bf16.vlgmr.msra.gmra.mxu2 %vm417_vm0, %v724_v48 }
 0x3e7   : > { %v749_v49 = vpop.f32.mrf.mxu2 }
 0x3e8   : > { %754 = vrot.lane.b32.xlu2 %v749_v49, %s1433_s12 }
 0x3ef   : > { %v751_v50 = vpop.f32.mrf.mxu2 }
 0x442   : > { %v755_v51 = vpop.permute.xlu2 %754 }
 0x443   : > { %v757_v53 = vadd.f32 %v755_v51, %v628_v24 }
 0x445   : > { %v763_v54 = vadd.f32 %v761_v52, %v757_v53 }
 0x447   : > { %1031 = vtanh.f32 %v763_v54 }
 0x448   : > { %1064 = shalt.err (!%p1061_p3)
}
 0x449   : > { %975 = dma.vmem_to_hbm [thread:$0]  (%p1234_p5), %s807_s22, 128, %s809_s24, %s780_s14   ;;  %v666_v56 = vperm.slane %v1315_v9, 0 }
 0x44a   : > { %s790_s2 = scalar_lea.hbm %s1412_s10, %s953_s13  ;;  %s1434_s3 = sshll.u32 %s1320_s25, 3 }
 0x44b   : > { %v667_v57 = vadd.f32 %v666_v56, %v1330_v26  ;;  %s381_s4 = scalar_lea.vmem [#allocation2], %s1434_s3  ;;  %s794_s6 = sshll.u32 %s790_s2, 4  ;;  %s795_s6 = int_to_ptr.hbm [resolvable:$true] %s794_s6 }
 0x44c   : > { %s792_s5 = sshll.u32 %s381_s4, 4  ;;  %s775_s14 = scalar_lea.sflag [#allocation3], %s1320_s25  ;;  %s793_s5 = int_to_ptr.vmem [resolvable:$true] %s792_s5 }
 0x44d   : > { %v1032_v55 = vpop.eup %1031  ;;  %v940_v58 = vmul.f32 -1.442695, %v667_v57  ;;  %s1079_s21 = sshra.s32 %s795_s6, 4  ;;  %s1085_s30 = scalar_lea.hbm %s1412_s10, 16  ;;  %s1080_s21 = int_to_ptr.hbm [resolvable:$true] %s1079_s21 }
 0x44e   : > { %768 = vrot.lane.b32.xlu0 %v1032_v55, %s1433_s12  ;;  %s1081_s15 = scalar_lea.hbm %s1080_s21, 8  ;;  %p1086_p9 = scmp.lt.s32.totalorder %s1080_s21, %s1412_s10 }
 0x44f   : > { %1033 = vpow2.f32 %v940_v58  ;;  %p1082_p4 = scmp.ne.s32.totalorder %s1080_s21, %s1081_s15  ;;  %p1087_p10 = scmp.lt.s32.totalorder %s1085_s30, %s1081_s15 }
 0x451   : > { %p1083_p7 = pnand %p1082_p4, %p1234_p5  ;;  %p1088_p11 = por %p1087_p10, %p1086_p9 }
 0x453   : > { %p1084_p8 = pneg %p1083_p7 }
 0x455   : > { %v1034_v59 = vpop.eup %1033  ;;  %p1089_p12 = pnand %p1088_p11, %p1084_p8 }
 0x456   : > { %v671_v60 = vadd.f32 1.0, %v1034_v59 }
 0x458   : > { %1035 = vrcp.f32 %v671_v60  ;;  %v683_v3 = vand.u32 2147483648, %v671_v60  ;;  %vm677_vm10 = vweird.f32 %v671_v60  ;;  %v681_v4 = vand.u32 2147483647, %v671_v60 }
 0x45a   : > { %v684_v6 = vor.u32 1.1754944e-38, %v683_v3  ;;  %vm682_vm12 = vcmp.eq.f32.partialorder %v681_v4, 8.507059e+37 }
 0x45e   : > { %v1036_v61 = vpop.eup %1035 }
 0x45f   : > { %v673_v62 = vmul.f32 %v1036_v61, %v671_v60  ;;  %vm678_vm9 = vweird.f32 %v1036_v61 }
 0x460   : > { %vm679_vm11 = vmor %vm677_vm10, %vm678_vm9 }
 0x461   : > { %v674_v63 = vsub.f32 1.0, %v673_v62 }
 0x463   : > { %v675_v0 = vmul.f32 %v1036_v61, %v674_v63 }
 0x465   : > { %v676_v1 = vadd.f32 %v1036_v61, %v675_v0 }
 0x467   : > { %v680_v5 = vsel %vm679_vm11, %v1036_v61, %v676_v1 }
 0x468   : > { %v685_v7 = vsel %vm682_vm12, %v684_v6, %v680_v5 }
 0x469   : > { %v765_v8 = vsub.f32 1.0, %v685_v7 }
 0x46b   : > { %v766_v10 = vmul.f32 %v765_v8, %v1255_v2 }
 0x4c0   : > { %v769_v9 = vpop.permute.xlu0 %768 }
 0x4c1   : > { %v771_v11 = vmul.f32 %v769_v9, %v685_v7 }
 0x4c3   : > { %v772_v12 = vadd.f32 %v771_v11, %v766_v10 }
 0x4c5   : > { %773 = vst.msk [vmem:[%s381_s4] sm:$0xff] %vm417_vm0, %v772_v12 }
 0x4c6   : > { %1092 = shalt.err (!%p1089_p12)
}
 0x4c7   : > { %974 = dma.vmem_to_hbm [thread:$0]  (%p1234_p5), %s793_s5, 128, %s795_s6, %s775_s14  }
 0x4c8 PF: > { %p985_p13 = scmp.ge.s32.totalorder %s1131_s20, 2  ;;  %s820_s25 = sand.u32 1, %s1119_s17  }
 0x4c9   : > { %s821_s22 = scalar_lea.sflag [#allocation3], %s820_s25 }
 0x4ca   : > { %p979_p0 = pnand %p985_p13, %p1238_p6 }
 0x4cc   : > { %p980_p1 = pneg %p979_p0 }
 0x4ce   : > { %1110 = dma.done.wait (%p980_p1), %s821_s22, 128  }
 0x4cf   : > { %1112 = vsyncadd (%p980_p1), %s821_s22, 4294967168  ;;  %s831_s24 = scalar_lea.sflag [#allocation5], %s820_s25 }
 0x4d0   : > { %1114 = dma.done.wait (%p980_p1), %s831_s24, 128  }
 0x4d1   : > { %1116 = vsyncadd (%p980_p1), %s831_s24, 4294967168  ;;  %p25_p5 = scmp.ge.s32.totalorder %s1221_s23, 4   ;;  %s1435_s17 = smov %s1123_s18 }
 0x4d2   : > { %s1436_s18 = smov %s1127_s19  ;;  %s1437_s19 = smov %s1232_s26 }
 0x4d3   : > { %s1438_s20 = smov %s1221_s23  ;;  %27 = sbr.rel (!%p25_p5) target bundleno = 13 (0xd), region = 112 }
 0x4d8   :  { %837 = vsyncpa [#allocation3], 1 }
 0x4d9   :  { %839 = vsyncpa [#allocation3 + $0x1], 1 }
 0x4da   :  { %840 = vsyncpa [#allocation5], 1 }
 0x4db   :  { %842 = vsyncpa [#allocation5 + $0x1], 1 }

</bundles_post_ra>
